<compile_context>
chip_gen: v7x
topology: tpu7x:2x2x1
jax: 0.10.0
libtpu: 0.0.40
codegen_flags: <defaults>
</compile_context>

<pallas_src>
import math

import jax
import jax.numpy as jnp
from jax.experimental import pallas as pl
from jax.experimental.pallas import tpu as pltpu


def _to_2tuple(v):
    return tuple(v) if isinstance(v, (tuple, list)) else (v, v)


def _round_up(a, b):
    return pl.cdiv(a, b) * b


def _patch_embed_kernel(p_ref, w_ref, b_ref, o_ref):
    # p_ref: (tm, K)   bf16 patches tile (streamed per grid step)
    # w_ref: (K, Ep)   bf16 projection weight (constant block index -> resident)
    # b_ref: (1, Ep)   f32 bias (resident)
    # o_ref: (tm, Ep)  output tile (lane-dense, Ep % 128 == 0)
    acc = jnp.dot(p_ref[...], w_ref[...], preferred_element_type=jnp.float32)
    o_ref[...] = (acc + b_ref[...]).astype(o_ref.dtype)


def patch_embed_matmul(patches, weight, bias, *, tm=512, out_dtype=jnp.bfloat16):
    """patches (M, K) bf16 @ weight (K, Ep) bf16 + bias (Ep,) f32 -> (M, Ep).

    Ep must be a multiple of 128 (lane-dense output). M is arbitrary; the ragged
    last M-block is handled by Pallas boundary masking (no explicit pad/slice).
    """
    M, K = patches.shape
    Kw, Ep = weight.shape
    assert K == Kw and Ep % 128 == 0

    # Big row tile (few ~0.35us grid steps, large DMAs), clamped for tiny M.
    tm = max(128, min(tm, _round_up(M, 128)))
    if M > 128:
        # Keep >= 2 grid steps so both v7x TensorCores get work ("parallel" axis).
        tm = min(tm, max(128, _round_up(pl.cdiv(M, 2), 128)))
    grid_m = pl.cdiv(M, tm)

    bias2d = bias.reshape(1, Ep).astype(jnp.float32)
    isz = lambda d: jnp.dtype(d).itemsize

    # Double-buffered streamed tiles + (double-buffered) resident weight/bias.
    vmem_need = (2 * tm * K * isz(patches.dtype)
                 + 2 * tm * Ep * isz(out_dtype)
                 + 2 * K * Ep * isz(weight.dtype)
                 + 2 * Ep * 4)
    vmem_limit = int(min(max(int(1.5 * vmem_need), 16 * 1024 * 1024),
                         48 * 1024 * 1024))

    cost = pl.CostEstimate(
        flops=2 * M * K * Ep,
        transcendentals=0,
        bytes_accessed=(M * K * isz(patches.dtype)
                        + K * Ep * isz(weight.dtype)
                        + Ep * 4
                        + M * Ep * isz(out_dtype)))

    return pl.pallas_call(
        _patch_embed_kernel,
        out_shape=jax.ShapeDtypeStruct((M, Ep), out_dtype),
        grid=(grid_m,),
        in_specs=[
            pl.BlockSpec((tm, K), lambda i: (i, 0)),    # streamed LHS tile
            pl.BlockSpec((K, Ep), lambda i: (0, 0)),    # resident weight
            pl.BlockSpec((1, Ep), lambda i: (0, 0)),    # resident bias
        ],
        out_specs=pl.BlockSpec((tm, Ep), lambda i: (i, 0)),
        compiler_params=pltpu.CompilerParams(
            dimension_semantics=("parallel",),
            vmem_limit_bytes=vmem_limit,
        ),
        cost_estimate=cost,
    )(patches, weight, bias2d)


class PatchEmbed2D:
    """JAX/Pallas port of the PyTorch PatchEmbed2D (Conv2d patch projection).

    MXU path is bf16-in / f32-accumulate; output is written as bf16 by default
    (pass out_dtype=jnp.float32 for an f32 container with bf16-level accuracy).
    """

    def __init__(self, img_size=224, patch_size=16, in_chans=3, embed_dim=768,
                 stride=10, key=None, out_dtype=jnp.bfloat16):
        img_size = _to_2tuple(img_size)
        patch_size = _to_2tuple(patch_size)
        stride = _to_2tuple(stride)
        self.img_size = img_size
        self.patch_size = patch_size
        self.stride = stride
        self.in_chans = in_chans
        self.embed_dim = embed_dim
        self.out_dtype = jnp.dtype(out_dtype)

        h = (img_size[0] - patch_size[0]) // stride[0] + 1
        w = (img_size[1] - patch_size[1]) // stride[1] + 1
        self.patch_hw = (h, w)
        self.num_patches = h * w
        self.input_token_size = (h, w)

        # Conv2d-style init: weight (E, C, ph, pw), bias (E,), U(-1/sqrt(fan_in), +).
        if key is None:
            key = jax.random.PRNGKey(0)
        kw_, kb_ = jax.random.split(key)
        K = in_chans * patch_size[0] * patch_size[1]
        bound = 1.0 / math.sqrt(K)
        self.proj_weight = jax.random.uniform(
            kw_, (embed_dim, in_chans, patch_size[0], patch_size[1]),
            jnp.float32, -bound, bound)
        self.proj_bias = jax.random.uniform(kb_, (embed_dim,), jnp.float32, -bound, bound)

        # Precompute the dense projection matrix ONCE: (K_pad, E_pad) in bf16.
        # K (MXU contraction) zero-padded to 128; E zero-padded to 128 for
        # lane-dense output stores. Both pads are mathematical no-ops.
        self.K = K
        self.K_pad = int(_round_up(K, 128))
        self.E_pad = int(_round_up(embed_dim, 128))
        w2d = self.proj_weight.reshape(embed_dim, K).T     # (K, E), order (C, ph, pw)
        w2d = jnp.pad(w2d, ((0, self.K_pad - K), (0, self.E_pad - embed_dim)))
        bias_p = jnp.pad(self.proj_bias, (0, self.E_pad - embed_dim))
        self.w_kE = w2d.astype(jnp.bfloat16)
        self.bias_E = bias_p.astype(jnp.float32)

    def __call__(self, x):
        B, C, H, W = x.shape
        ph, pw = self.patch_size
        sh, sw = self.stride
        Ho = (H - ph) // sh + 1
        Wo = (W - pw) // sw + 1
        E = self.embed_dim

        # im2col in bf16 (halves DMA bytes into the kernel). Feature order is
        # (C, ph, pw), matching the flattened Conv2d weight layout.
        xb = x.astype(jnp.bfloat16)
        if (sh, sw) == (ph, pw) and H % ph == 0 and W % pw == 0:
            # Non-overlapping fast path: pure reshape/transpose, no gather/conv.
            xr = xb.reshape(B, C, Ho, ph, Wo, pw)
            patches = jnp.transpose(xr, (0, 2, 4, 1, 3, 5)).reshape(B * Ho * Wo, self.K)
        else:
            # Overlapping stride: extract windows directly into (B, Ho, Wo, K)
            # with channel-major feature order (matches the flattened weight).
            patches = jax.lax.conv_general_dilated_patches(
                xb, filter_shape=(ph, pw), window_strides=(sh, sw),
                padding="VALID",
                dimension_numbers=("NCHW", "OIHW", "NHWC"),
            ).reshape(B * Ho * Wo, self.K)

        if self.K_pad != self.K:
            patches = jnp.pad(patches, ((0, 0), (0, self.K_pad - self.K)))

        out = patch_embed_matmul(patches, self.w_kE, self.bias_E,
                                 tm=512, out_dtype=self.out_dtype)
        if self.E_pad != E:
            out = out[:, :E]                       # drop lane padding
        return out.reshape(B, Ho * Wo, E)          # == proj(x).flatten(2).transpose(1,2)


def _reference(x, weight, bias, stride):
    """Pure-JAX reference via lax.conv (== PyTorch Conv2d, padding=0)."""
    y = jax.lax.conv_general_dilated(
        x, weight, window_strides=stride, padding="VALID",
        dimension_numbers=("NCHW", "OIHW", "NCHW"))
    y = y + bias.reshape(1, -1, 1, 1)
    B, E = y.shape[0], y.shape[1]
    return jnp.transpose(y.reshape(B, E, -1), (0, 2, 1))


if __name__ == "__main__":
    # Small config consistent with the module: B=2, C=4, H=W=16,
    # patch=8, stride=4 (overlapping), embed_dim=32 -> 3*3 = 9 tokens per image.
    B, C, H, W = 2, 4, 16, 16
    key = jax.random.PRNGKey(0)
    kx, kp = jax.random.split(key)
    x = jax.random.normal(kx, (B, C, H, W), jnp.float32)

    mod = PatchEmbed2D(img_size=16, patch_size=8, in_chans=4, embed_dim=32,
                       stride=4, key=kp)

    out = mod(x)
    out = jax.block_until_ready(out)

    # Reference on bf16-quantized inputs (kernel feeds bf16 to the MXU, accumulates
    # f32, stores bf16).
    x_q = x.astype(jnp.bfloat16).astype(jnp.float32)
    w_q = mod.proj_weight.astype(jnp.bfloat16).astype(jnp.float32)
    ref = _reference(x_q, w_q, mod.proj_bias, mod.stride)

    assert out.shape == (B, mod.num_patches, mod.embed_dim), out.shape
    err = float(jnp.max(jnp.abs(out.astype(jnp.float32) - ref)))
    assert err < 2e-2, err
    print("KERNEL_OK")
</pallas_src>

<mosaic_0001>
module attributes {stable_mosaic.version = 11 : i64} {
  func.func @_patch_embed_kernel(%arg0: i32, %arg1: memref<128x256xbf16, #tpu.memory_space<vmem>>, %arg2: memref<256x128xbf16, #tpu.memory_space<vmem>>, %arg3: memref<1x128xf32, #tpu.memory_space<vmem>>, %arg4: memref<128x128xbf16, #tpu.memory_space<vmem>>) attributes {dimension_semantics = [#tpu.dimension_semantics<parallel>], iteration_bounds = array<i64: 1>, scalar_prefetch = 0 : i64, scratch_operands = 0 : i64, tpu.core_type = #tpu.core_type<tc>, window_params = [{transform_indices = @transform_0, window_bounds = array<i64: 128, 256>}, {pipeline_mode = #tpu.pipeline_mode<synchronous>, transform_indices = @transform_1, window_bounds = array<i64: 256, 128>}, {pipeline_mode = #tpu.pipeline_mode<synchronous>, transform_indices = @transform_2, window_bounds = array<i64: 1, 128>}, {transform_indices = @transform_3, window_bounds = array<i64: 128, 128>}]} {
    %c0 = arith.constant 0 : index
    %c0_0 = arith.constant 0 : index
    %0 = vector.load %arg1[%c0, %c0_0] : memref<128x256xbf16, #tpu.memory_space<vmem>>, vector<128x256xbf16>
    %c0_1 = arith.constant 0 : index
    %c0_2 = arith.constant 0 : index
    %1 = vector.load %arg2[%c0_1, %c0_2] : memref<256x128xbf16, #tpu.memory_space<vmem>>, vector<256x128xbf16>
    %cst = arith.constant dense<0.000000e+00> : vector<128x128xf32>
    %2 = tpu.matmul %0, %1, %cst {dimension_numbers = #tpu.dot_dimension_numbers<[1], [0], [0], [1], [0, 0, 1, 1], [], []>} : vector<128x256xbf16>, vector<256x128xbf16>, vector<128x128xf32> -> vector<128x128xf32>
    %c0_3 = arith.constant 0 : index
    %c0_4 = arith.constant 0 : index
    %3 = vector.load %arg3[%c0_3, %c0_4] : memref<1x128xf32, #tpu.memory_space<vmem>>, vector<1x128xf32>
    %4 = vector.broadcast %3 : vector<1x128xf32> to vector<128x128xf32>
    %5 = arith.addf %2, %4 : vector<128x128xf32>
    %6 = arith.truncf %5 : vector<128x128xf32> to vector<128x128xbf16>
    %c0_5 = arith.constant 0 : index
    %c0_6 = arith.constant 0 : index
    %7 = vector.load %arg4[%c0_5, %c0_6] : memref<128x128xbf16, #tpu.memory_space<vmem>>, vector<128x128xbf16>
    tpu.vector_store %arg4[%c0_5, %c0_6], %6 {strides = array<i32>} : memref<128x128xbf16, #tpu.memory_space<vmem>>, vector<128x128xbf16>,
    return
  }
  func.func @transform_0(%arg0: i32) -> (i32, i32) {
    %c0_i32 = arith.constant 0 : i32
    %c0_i32_0 = arith.constant 0 : i32
    return %arg0, %c0_i32 : i32, i32
  }
  func.func @transform_1(%arg0: i32) -> (i32, i32) {
    %c0_i32 = arith.constant 0 : i32
    %c0_i32_0 = arith.constant 0 : i32
    %c0_i32_1 = arith.constant 0 : i32
    return %c0_i32, %c0_i32_0 : i32, i32
  }
  func.func @transform_2(%arg0: i32) -> (i32, i32) {
    %c0_i32 = arith.constant 0 : i32
    %c0_i32_0 = arith.constant 0 : i32
    %c0_i32_1 = arith.constant 0 : i32
    return %c0_i32, %c0_i32_0 : i32, i32
  }
  func.func @transform_3(%arg0: i32) -> (i32, i32) {
    %c0_i32 = arith.constant 0 : i32
    %c0_i32_0 = arith.constant 0 : i32
    return %arg0, %c0_i32 : i32, i32
  }
}

</mosaic_0001>

<bundles_post_ra>
// kernel: tpu_custom_call.1
= control target key start
LH: loop header
LB: loop body
LE: loop exit
PB: predicated region body
PF: predicated region fallthrough
CT: control target
= control target key end

     0   :  { %8 = vsyncpa [#allocation3], 0  ;;  %s871_s0 = inlined_call_operand.hbm [shape: bf16[18,256], index: 0, kind: input, shape index: {}]   ;;  %s872_s1 = inlined_call_operand.hbm [shape: bf16[256,128], index: 1, kind: input, shape index: {}]   ;;  %s873_s2 = inlined_call_operand.vmem [shape: f32[1,128], index: 2, kind: input, shape index: {}]   ;;  %s874_s3 = inlined_call_operand.hbm [shape: bf16[18,128], index: 3, kind: output, shape index: {}]  }
   0x1   :  { %9 = vsyncpa [#allocation6], 0 }
   0x2   :  { %10 = vsyncpa [#allocation4], 0 }
   0x3   :  { %15 = vsyncadd [#allocation3], 1664  ;;  %s781_s12 = smov [#allocation2]   ;;  %s709_s16 = scalar_lea.hbm %s871_s0, 384 }
   0x4   :  { %s16_s13 = sshll.u32 %s781_s12, 4  ;;  %p710_p0 = scmp.ne.s32.totalorder %s871_s0, %s709_s16  ;;  %s17_s13 = int_to_ptr.vmem [resolvable:$true] %s16_s13 }
   0x5   :  { %p713_p1 = scmp.lt.u32.totalorder %s709_s16, %s871_s0 }
   0x7   :  { %p715_p2 = pnand %p713_p1, %p710_p0 }
   0x9   :  { %718 = shalt.err (!%p715_p2)
}
   0xa   :  { %s719_s21 = scalar_lea.vmem %s17_s13, 384  ;;  %s723_s22 = scalar_lea.vmem %s17_s13, 2048 }
   0xb   :  { %p720_p3 = scmp.ne.s32.totalorder %s17_s13, %s719_s21  ;;  %p724_p4 = scmp.lt.s32.totalorder %s17_s13, %s17_s13 }
   0xc   :  { %p725_p5 = scmp.lt.s32.totalorder %s723_s22, %s719_s21 }
   0xe   :  { %p726_p6 = por %p725_p5, %p724_p4 }
  0x10   :  { %p727_p7 = pnand %p726_p6, %p720_p3 }
  0x12   :  { %730 = shalt.err (!%p727_p7)
}
  0x13   :  { %s782_s23 = smov 128   ;;  %s783_s24 = smov 8  }
  0x14   :  { %22 = dma.hbm_to_vmem [thread:$0]  %s871_s0, 384, %s17_s13, [#allocation3], %s782_s23, %s782_s23, %s783_s24  }
  0x15   :  { %s784_s27 = smov [#allocation5]   ;;  %s731_s4 = scalar_lea.hbm %s872_s1, 2048 }
  0x16   :  { %s28_s28 = sshll.u32 %s784_s27, 4  ;;  %p732_p8 = scmp.ne.s32.totalorder %s872_s1, %s731_s4  ;;  %s29_s28 = int_to_ptr.vmem [resolvable:$true] %s28_s28 }
  0x17   :  { %p735_p9 = scmp.lt.u32.totalorder %s731_s4, %s872_s1 }
  0x19   :  { %p737_p10 = pnand %p735_p9, %p732_p8 }
  0x1b   :  { %740 = shalt.err (!%p737_p10)
}
  0x1c   :  { %s741_s9 = scalar_lea.vmem %s29_s28, 2048  ;;  %p746_p12 = scmp.lt.s32.totalorder %s29_s28, %s29_s28 }
  0x1d   :  { %p742_p11 = scmp.ne.s32.totalorder %s29_s28, %s741_s9  ;;  %p747_p13 = scmp.lt.s32.totalorder %s741_s9, %s741_s9 }
  0x1f   :  { %p748_p0 = por %p747_p13, %p746_p12 }
  0x21   :  { %p749_p1 = pnand %p748_p0, %p742_p11 }
  0x23   :  { %752 = shalt.err (!%p749_p1)
}
  0x24   :  { %s785_s0 = smov 64   ;;  %s786_s10 = smov 4  }
  0x25   :  { %34 = dma.hbm_to_vmem [thread:$0]  %s872_s1, 2048, %s29_s28, [#allocation6], %s785_s0, %s785_s0, %s786_s10  }
  0x26   :  { %775 = dma.done.wait [#allocation3], 2048  }
  0x27   :  { %776 = vsyncadd [#allocation3], 4294965248 }
  0x28   :  { %777 = dma.done.wait [#allocation6], 2048  }
  0x29   :  { %778 = vsyncadd [#allocation6], 4294965248  ;;  %v669_v0 = vld [vmem:[#allocation5 + $0x40] sm:$0xff]   ;;  %v671_v2 = vld [vmem:[#allocation5 + $0x48] sm:$0xff]  }
  0x2a   :  { %v670_v1 = vld [vmem:[#allocation5] sm:$0xff]   ;;  %582 = vmatprep.subr.bf16.mxu0 %v669_v0  ;;  %646 = vmatprep.subr.bf16.mxu1 %v669_v0  ;;  %v672_v3 = vld [vmem:[#allocation5 + $0x8] sm:$0xff]   ;;  %v673_v4 = vld [vmem:[#allocation5 + $0x50] sm:$0xff]  }
  0x2b   :  { %583 = vmatpush3.bf16.msra.mxu0 %v670_v1  ;;  %654 = vmatpush3.bf16.msra.mxu1 %v670_v1  ;;  %v674_v5 = vld [vmem:[#allocation5 + $0x10] sm:$0xff]   ;;  %v675_v6 = vld [vmem:[#allocation5 + $0x58] sm:$0xff]   ;;  %v677_v8 = vld [vmem:[#allocation5 + $0x60] sm:$0xff]  }
  0x2c   :  { %584 = vmatprep.subr.bf16.mxu0 %v671_v2  ;;  %647 = vmatprep.subr.bf16.mxu1 %v671_v2  ;;  %v676_v7 = vld [vmem:[#allocation5 + $0x18] sm:$0xff]   ;;  %v678_v9 = vld [vmem:[#allocation5 + $0x20] sm:$0xff]   ;;  %v679_v10 = vld [vmem:[#allocation5 + $0x68] sm:$0xff]  }
  0x2d   :  { %v687_v11 = vld [vmem:[#allocation2 + $0x4] ss:$8 sps:$4 sm:$0xff]   ;;  %v681_v14 = vld [vmem:[#allocation5 + $0x70] sm:$0xff]   ;;  %v683_v16 = vld [vmem:[#allocation5 + $0x78] sm:$0xff]  }
  0x2e   :  { %v690_v12 = vld [vmem:[#allocation2 + $0x44] ss:$8 sps:$4 sm:$0xff]   ;;  %307 = vmatprep.mubr.bf16.mxu0 %v687_v11  ;;  %v682_v15 = vld [vmem:[#allocation5 + $0x30] sm:$0xff]   ;;  %v684_v17 = vld [vmem:[#allocation5 + $0x38] sm:$0xff]  }
  0x2f   :  { %585 = vmatpush3.bf16.msra.mxu0 %v672_v3  ;;  %655 = vmatpush3.bf16.msra.mxu1 %v672_v3  ;;  %v680_v13 = vld [vmem:[#allocation5 + $0x28] sm:$0xff]   ;;  %v691_v20 = vld [vmem:[#allocation2 + $0x14] ss:$8 sps:$4 sm:$0xff]   ;;  %v695_v22 = vld [vmem:[#allocation2 + $0x10] ss:$8 sps:$4 sm:$0xff]  }
  0x30   :  { %586 = vmatprep.subr.bf16.mxu0 %v673_v4  ;;  %648 = vmatprep.subr.bf16.mxu1 %v673_v4  ;;  %v685_v18 = vld [vmem:[#allocation2] ss:$8 sps:$4 sm:$0xff]   ;;  %v693_v21 = vld [vmem:[#allocation2 + $0x54] ss:$8 sps:$4 sm:$0xff]   ;;  %v696_v23 = vld [vmem:[#allocation2 + $0x50] ss:$8 sps:$4 sm:$0xff]  }
  0x31   :  { %339 = vmatprep.mubr.bf16.mxu1 %v690_v12  ;;  %v688_v19 = vld [vmem:[#allocation2 + $0x40] ss:$8 sps:$4 sm:$0xff]   ;;  %v697_v24 = vld [vmem:[#allocation2 + $0x24] ss:$8 sps:$4 sm:$0xff]   ;;  %v703_v28 = vld [vmem:[#allocation2 + $0x34] ss:$8 sps:$4 sm:$0xff]  }
  0x32   :  { %v699_v25 = vld [vmem:[#allocation2 + $0x64] ss:$8 sps:$4 sm:$0xff]   ;;  %v701_v26 = vld [vmem:[#allocation2 + $0x20] ss:$8 sps:$4 sm:$0xff]   ;;  %v705_v29 = vld [vmem:[#allocation2 + $0x74] ss:$8 sps:$4 sm:$0xff]  }
  0x33   :  { %587 = vmatpush3.bf16.msra.mxu0 %v674_v5  ;;  %656 = vmatpush3.bf16.msra.mxu1 %v674_v5  ;;  %v702_v27 = vld [vmem:[#allocation2 + $0x60] ss:$8 sps:$4 sm:$0xff]   ;;  %v707_v30 = vld [vmem:[#allocation2 + $0x30] ss:$8 sps:$4 sm:$0xff]  }
  0x34   :  { %588 = vmatprep.subr.bf16.mxu0 %v675_v6  ;;  %649 = vmatprep.subr.bf16.mxu1 %v675_v6  ;;  %v708_v31 = vld [vmem:[#allocation2 + $0x70] ss:$8 sps:$4 sm:$0xff]   ;;  %v838_v40 = vld [vmem:[%s873_s2] ss:$0 sm:$0xff] }
  0x37   :  { %589 = vmatpush3.bf16.msra.mxu0 %v676_v7  ;;  %657 = vmatpush3.bf16.msra.mxu1 %v676_v7 }
  0x38   :  { %590 = vmatprep.subr.bf16.mxu0 %v677_v8  ;;  %650 = vmatprep.subr.bf16.mxu1 %v677_v8 }
  0x3b   :  { %591 = vmatpush3.bf16.msra.mxu0 %v678_v9  ;;  %658 = vmatpush3.bf16.msra.mxu1 %v678_v9 }
  0x3c   :  { %592 = vmatprep.subr.bf16.mxu0 %v679_v10  ;;  %651 = vmatprep.subr.bf16.mxu1 %v679_v10 }
  0x3f   :  { %593 = vmatpush3.bf16.msra.mxu0 %v680_v13  ;;  %659 = vmatpush3.bf16.msra.mxu1 %v680_v13 }
  0x40   :  { %594 = vmatprep.subr.bf16.mxu0 %v681_v14  ;;  %652 = vmatprep.subr.bf16.mxu1 %v681_v14 }
  0x43   :  { %595 = vmatpush3.bf16.msra.mxu0 %v682_v15  ;;  %660 = vmatpush3.bf16.msra.mxu1 %v682_v15 }
  0x44   :  { %596 = vmatprep.subr.bf16.mxu0 %v683_v16  ;;  %653 = vmatprep.subr.bf16.mxu1 %v683_v16 }
  0x47   :  { %597 = vmatpush3.bf16.msra.mxu0 %v684_v17  ;;  %661 = vmatpush3.bf16.msra.mxu1 %v684_v17 }
  0x4a   :  { %308 = vmatmul.mubr.bf16.vlgmr.msra.gmra.mrb[0].mxu0 %v685_v18  ;;  %340 = vmatmul.mubr.bf16.vlgmr.msra.gmra.mrb[0].mxu1 %v688_v19 }
  0x4b   :  { %315 = vmatprep.mubr.bf16.mxu0 %v691_v20  ;;  %347 = vmatprep.mubr.bf16.mxu1 %v693_v21 }
  0x52   :  { %316 = vmatmul.mubr.bf16.gmra.mrb[4].mxu0 %v695_v22  ;;  %348 = vmatmul.mubr.bf16.gmra.mrb[4].mxu1 %v696_v23 }
  0x53   :  { %323 = vmatprep.mubr.bf16.mxu0 %v697_v24  ;;  %355 = vmatprep.mubr.bf16.mxu1 %v699_v25 }
  0x5a   :  { %324 = vmatmul.mubr.bf16.gmra.mrb[8].mxu0 %v701_v26  ;;  %356 = vmatmul.mubr.bf16.gmra.mrb[8].mxu1 %v702_v27 }
  0x5b   :  { %331 = vmatprep.mubr.bf16.mxu0 %v703_v28  ;;  %363 = vmatprep.mubr.bf16.mxu1 %v705_v29 }
  0x62   :  { %332 = vmatmul.mubr.bf16.gmra.mrb[12].mxu0 %v707_v30  ;;  %364 = vmatmul.mubr.bf16.gmra.mrb[12].mxu1 %v708_v31 }
 0x11d   :  { %v598_v32 = vpop.f32.mrb[0].mxu0  ;;  %v622_v33 = vpop.f32.mrb[0].mxu1 }
 0x11e   :  { %v599_v34 = vpop.f32.mrb[1].mxu0  ;;  %v623_v35 = vpop.f32.mrb[1].mxu1 }
 0x11f   :  { %v600_v36 = vadd.f32 %v599_v34, %v598_v32  ;;  %v624_v37 = vadd.f32 %v623_v35, %v622_v33  ;;  %v601_v38 = vpop.f32.mrb[2].mxu0  ;;  %v625_v39 = vpop.f32.mrb[2].mxu1 }
 0x120   :  { %v602_v41 = vpop.f32.mrb[3].mxu0  ;;  %v626_v42 = vpop.f32.mrb[3].mxu1 }
 0x121   :  { %v603_v43 = vadd.f32 %v602_v41, %v601_v38  ;;  %v627_v44 = vadd.f32 %v626_v42, %v625_v39  ;;  %v310_v45 = vadd.f32 %v600_v36, %v838_v40  ;;  %v342_v46 = vadd.f32 %v624_v37, %v838_v40 }
 0x123   :  { %v313_v47 = vadd.f32 %v603_v43, %v838_v40  ;;  %v345_v48 = vadd.f32 %v627_v44, %v838_v40 }
 0x125   :  { %v538_v49 = vpack.c.bf16 %v313_v47, %v310_v45  ;;  %v558_v50 = vpack.c.bf16 %v345_v48, %v342_v46  ;;  %v604_v51 = vpop.f32.mrb[4].mxu0  ;;  %v628_v52 = vpop.f32.mrb[4].mxu1 }
 0x126   :  { %v605_v53 = vpop.f32.mrb[5].mxu0  ;;  %v629_v54 = vpop.f32.mrb[5].mxu1 }
 0x127   :  { %539 = vst [vmem:[#allocation7] sm:$0xff] %v538_v49   ;;  %578 = vst [vmem:[#allocation7 + $0x20] sm:$0xff] %v558_v50   ;;  %v606_v55 = vadd.f32 %v605_v53, %v604_v51  ;;  %v630_v56 = vadd.f32 %v629_v54, %v628_v52  ;;  %v607_v57 = vpop.f32.mrb[6].mxu0  ;;  %v631_v58 = vpop.f32.mrb[6].mxu1 }
 0x128   :  { %v608_v59 = vpop.f32.mrb[7].mxu0  ;;  %v632_v60 = vpop.f32.mrb[7].mxu1 }
 0x129   :  { %v609_v61 = vadd.f32 %v608_v59, %v607_v57  ;;  %v633_v62 = vadd.f32 %v632_v60, %v631_v58  ;;  %v318_v63 = vadd.f32 %v606_v55, %v838_v40  ;;  %v350_v0 = vadd.f32 %v630_v56, %v838_v40 }
 0x12b   :  { %v321_v1 = vadd.f32 %v609_v61, %v838_v40  ;;  %v353_v2 = vadd.f32 %v633_v62, %v838_v40 }
 0x12d   :  { %v543_v3 = vpack.c.bf16 %v321_v1, %v318_v63  ;;  %v563_v4 = vpack.c.bf16 %v353_v2, %v350_v0  ;;  %v610_v5 = vpop.f32.mrb[8].mxu0  ;;  %v634_v6 = vpop.f32.mrb[8].mxu1 }
 0x12e   :  { %v611_v7 = vpop.f32.mrb[9].mxu0  ;;  %v635_v8 = vpop.f32.mrb[9].mxu1 }
 0x12f   :  { %575 = vst [vmem:[#allocation7 + $0x8] sm:$0xff] %v543_v3   ;;  %579 = vst [vmem:[#allocation7 + $0x28] sm:$0xff] %v563_v4   ;;  %v612_v9 = vadd.f32 %v611_v7, %v610_v5  ;;  %v636_v10 = vadd.f32 %v635_v8, %v634_v6  ;;  %v613_v11 = vpop.f32.mrb[10].mxu0  ;;  %v637_v12 = vpop.f32.mrb[10].mxu1 }
 0x130   :  { %v614_v13 = vpop.f32.mrb[11].mxu0  ;;  %v638_v14 = vpop.f32.mrb[11].mxu1 }
 0x131   :  { %v615_v15 = vadd.f32 %v614_v13, %v613_v11  ;;  %v639_v16 = vadd.f32 %v638_v14, %v637_v12  ;;  %v326_v17 = vadd.f32 %v612_v9, %v838_v40  ;;  %v358_v18 = vadd.f32 %v636_v10, %v838_v40 }
 0x133   :  { %v329_v19 = vadd.f32 %v615_v15, %v838_v40  ;;  %v361_v20 = vadd.f32 %v639_v16, %v838_v40 }
 0x135   :  { %v548_v21 = vpack.c.bf16 %v329_v19, %v326_v17  ;;  %v568_v22 = vpack.c.bf16 %v361_v20, %v358_v18  ;;  %v616_v23 = vpop.f32.mrb[12].mxu0  ;;  %v640_v24 = vpop.f32.mrb[12].mxu1 }
 0x136   :  { %v617_v25 = vpop.f32.mrb[13].mxu0  ;;  %v641_v26 = vpop.f32.mrb[13].mxu1 }
 0x137   :  { %576 = vst [vmem:[#allocation7 + $0x10] sm:$0xff] %v548_v21   ;;  %580 = vst [vmem:[#allocation7 + $0x30] sm:$0xff] %v568_v22   ;;  %v618_v27 = vadd.f32 %v617_v25, %v616_v23  ;;  %v642_v28 = vadd.f32 %v641_v26, %v640_v24  ;;  %v619_v29 = vpop.f32.mrb[14].mxu0  ;;  %v643_v30 = vpop.f32.mrb[14].mxu1 }
 0x138   :  { %v620_v31 = vpop.f32.mrb[15].mxu0  ;;  %v644_v32 = vpop.f32.mrb[15].mxu1 }
 0x139   :  { %v621_v33 = vadd.f32 %v620_v31, %v619_v29  ;;  %v645_v34 = vadd.f32 %v644_v32, %v643_v30  ;;  %v334_v35 = vadd.f32 %v618_v27, %v838_v40  ;;  %v366_v36 = vadd.f32 %v642_v28, %v838_v40 }
 0x13b   :  { %v337_v37 = vadd.f32 %v621_v33, %v838_v40  ;;  %v369_v38 = vadd.f32 %v645_v34, %v838_v40 }
 0x13d   :  { %v553_v39 = vpack.c.bf16 %v337_v37, %v334_v35  ;;  %v573_v41 = vpack.c.bf16 %v369_v38, %v366_v36 }
 0x13f   :  { %577 = vst [vmem:[#allocation7 + $0x18] sm:$0xff] %v553_v39   ;;  %581 = vst [vmem:[#allocation7 + $0x38] sm:$0xff] %v573_v41  }
 0x140   :  { %456 = vsyncadd [#allocation4], 832  ;;  %s787_s2 = smov [#allocation7]  }
 0x141   :  { %s457_s14 = sshll.u32 %s787_s2, 4  ;;  %s458_s14 = int_to_ptr.vmem [resolvable:$true] %s457_s14 }
 0x142   :  { %s753_s15 = scalar_lea.vmem %s458_s14, 192  ;;  %s757_s16 = scalar_lea.vmem %s458_s14, 1024 }
 0x143   :  { %p754_p2 = scmp.ne.s32.totalorder %s458_s14, %s753_s15  ;;  %p758_p3 = scmp.lt.s32.totalorder %s458_s14, %s458_s14 }
 0x144   :  { %p759_p4 = scmp.lt.s32.totalorder %s757_s16, %s753_s15 }
 0x146   :  { %p760_p5 = por %p759_p4, %p758_p3 }
 0x148   :  { %p761_p6 = pnand %p760_p5, %p754_p2 }
 0x14a   :  { %764 = shalt.err (!%p761_p6)
}
 0x14b   :  { %s765_s19 = scalar_lea.hbm %s874_s3, 192 }
 0x14c   :  { %p766_p7 = scmp.ne.s32.totalorder %s874_s3, %s765_s19  ;;  %p769_p8 = scmp.lt.u32.totalorder %s765_s19, %s874_s3 }
 0x14e   :  { %p771_p9 = pnand %p769_p8, %p766_p7 }
 0x150   :  { %774 = shalt.err (!%p771_p9)
}
 0x151   :  { %463 = dma.vmem_to_hbm [thread:$0]  %s458_s14, 192, %s874_s3, [#allocation4], %s785_s0, %s785_s0, %s786_s10  }
 0x152   :  { %779 = dma.done.wait [#allocation4], 1024  }
 0x153   :  { %780 = vsyncadd [#allocation4], 4294966272 }
 0x154   :  { %467 = vsyncpa [#allocation3], 1 }
 0x155   :  { %468 = vsyncpa [#allocation6], 1 }
 0x156   :  { %469 = vsyncpa [#allocation4], 1 }

</bundles_post_ra>
